<compile_context>
chip_gen: v6e
topology: v6e:2x2x1
jax: 0.10.0
libtpu: 0.0.40
codegen_flags: <defaults>
</compile_context>

<pallas_src>
import functools

import jax
import jax.numpy as jnp
from jax.experimental import pallas as pl
from jax.experimental.pallas import tpu as pltpu

D_in = 10
D_out = 1
H = 30

_H_PAD = 128    # padded hidden width (lane dimension of the resident weights)
_MAX_TB = 1024  # max batch-tile rows


def _ffn_kernel(x_ref, w1_ref, b1_ref, w2_ref, b2_ref, w3_ref, b3_ref, o_ref,
                *, matmul_dtype):
    # One (tb, D_in) batch tile per grid step; weights/biases are resident.
    x = x_ref[...]
    if matmul_dtype is not None:
        x = x.astype(matmul_dtype)

    # Layer 1: (tb, D_in) @ (D_in, H_pad) on the MXU (K padded in-register).
    h = jnp.dot(x, w1_ref[...], preferred_element_type=jnp.float32)
    h = jnp.maximum(h + b1_ref[...], 0.0)

    # Layer 2: (tb, H_pad) @ (H_pad, H_pad) on the MXU.
    h2 = h.astype(matmul_dtype) if matmul_dtype is not None else h
    h = jnp.dot(h2, w2_ref[...], preferred_element_type=jnp.float32)
    h = jnp.maximum(h + b2_ref[...], 0.0)

    # Layer 3 (D_out == 1): VPU multiply + XLU lane reduction — no MXU pass,
    # and the store is a narrow (tb, 1) tile.
    y = jnp.sum(h * w3_ref[...], axis=-1, keepdims=True) + b3_ref[...]
    o_ref[...] = y.astype(o_ref.dtype)


def _pad2(a, rows, cols):
    return jnp.pad(a, ((0, rows - a.shape[0]), (0, cols - a.shape[1])))


def _round_up(n, m):
    return (n + m - 1) // m * m


def _choose_batch_tile(b8, max_tb):
    """Pick a batch tile balancing padding waste vs. per-grid-step overhead."""
    best_tb, best_cost = 8, None
    c = 8
    while c <= max(8, max_tb):
        total = _round_up(b8, c)
        steps = total // c
        cost = total + 128 * steps  # ~128 rows of equivalent fixed per-step cost
        if best_cost is None or cost < best_cost:
            best_tb, best_cost = c, cost
        c *= 2
    return best_tb


@functools.partial(jax.jit, static_argnames=("use_bf16_matmuls",))
def feedforward(x, w1, b1, w2, b2, w3, b3, *, use_bf16_matmuls=False):
    """x: [B, D_in]; w_i: [in, out]; b_i: [out]. Returns [B, D_out] (x.dtype)."""
    B, d_in = x.shape
    h_dim = w1.shape[1]
    d_out = w3.shape[1]
    assert d_out == 1, "final layer is computed as a lane reduction (D_out == 1)"
    dtype = x.dtype

    h_pad = _round_up(max(h_dim, 1), _H_PAD)
    matmul_dtype = jnp.bfloat16 if use_bf16_matmuls else None
    w_dtype = jnp.bfloat16 if use_bf16_matmuls else jnp.float32

    # ---- pad only the (tiny, resident) weights/biases to the lane width -----
    w1p = _pad2(w1, d_in, h_pad).astype(w_dtype)                    # (D_in, H_pad)
    b1p = _pad2(b1.reshape(1, -1), 1, h_pad).astype(jnp.float32)    # (1, H_pad)
    w2p = _pad2(w2, h_pad, h_pad).astype(w_dtype)                   # (H_pad, H_pad)
    b2p = _pad2(b2.reshape(1, -1), 1, h_pad).astype(jnp.float32)    # (1, H_pad)
    w3t = _pad2(w3.T, 1, h_pad).astype(jnp.float32)                 # (1, H_pad)
    b3p = b3.reshape(1, 1).astype(jnp.float32)                      # (1, 1)

    # ---- batch tiling: pad rows only as far as the chosen tile requires -----
    b8 = _round_up(B, 8)
    tb = _choose_batch_tile(b8, _MAX_TB)
    # Multi-TensorCore parts (v7x): keep >= 2 grid steps so the "parallel"
    # batch axis can shard across cores.  No-op on single-TC chips.
    if _round_up(b8, tb) // tb <= 1 and b8 > 8:
        tb = max(8, _round_up((b8 + 1) // 2, 8))
    b_pad = _round_up(b8, tb)
    xp = x if b_pad == B else jnp.pad(x, ((0, b_pad - B), (0, 0)))
    grid = (b_pad // tb,)

    resident = lambda a: pl.BlockSpec(a.shape, lambda i: (0, 0))
    kernel = functools.partial(_ffn_kernel, matmul_dtype=matmul_dtype)

    out = pl.pallas_call(
        kernel,
        out_shape=jax.ShapeDtypeStruct((b_pad, d_out), dtype),
        grid=grid,
        in_specs=[
            pl.BlockSpec((tb, d_in), lambda i: (i, 0)),  # x: batch-tiled, unpadded lanes
            resident(w1p), resident(b1p),
            resident(w2p), resident(b2p),
            resident(w3t), resident(b3p),
        ],
        out_specs=pl.BlockSpec((tb, d_out), lambda i: (i, 0)),  # narrow output
        compiler_params=pltpu.CompilerParams(
            dimension_semantics=("parallel",)),
    )(xp, w1p, b1p, w2p, b2p, w3t, b3p)

    # Only padded batch rows need trimming; the feature width is already D_out.
    return out[:B]


def init_params(key, d_in=D_in, d_out=D_out, h=H, dtype=jnp.float32):
    """Deterministic init matching torch.nn.Linear shapes (stored transposed)."""
    ks = jax.random.split(key, 6)

    def linear(kw, kb, fan_in, fan_out):
        bound = 1.0 / jnp.sqrt(fan_in)
        w = jax.random.uniform(kw, (fan_in, fan_out), dtype, -bound, bound)
        b = jax.random.uniform(kb, (fan_out,), dtype, -bound, bound)
        return w, b

    w1, b1 = linear(ks[0], ks[1], d_in, h)
    w2, b2 = linear(ks[2], ks[3], h, h)
    w3, b3 = linear(ks[4], ks[5], h, d_out)
    return w1, b1, w2, b2, w3, b3


if __name__ == "__main__":
    key = jax.random.PRNGKey(0)
    k_x, k_p = jax.random.split(key)

    B = 13  # deliberately not a multiple of 8 to exercise batch padding
    x = jax.random.normal(k_x, (B, D_in), dtype=jnp.float32)
    w1, b1, w2, b2, w3, b3 = init_params(k_p)

    out = feedforward(x, w1, b1, w2, b2, w3, b3)
    out = jax.block_until_ready(out)

    # Reference check in plain JAX (same math, unpadded, f32).
    ref = jnp.maximum(x @ w1 + b1, 0.0)
    ref = jnp.maximum(ref @ w2 + b2, 0.0)
    ref = ref @ w3 + b3
    assert out.shape == (B, D_out), out.shape
    assert jnp.allclose(out, ref, atol=1e-5, rtol=1e-5)

    print("KERNEL_OK")
</pallas_src>

<mosaic_0001>
module attributes {stable_mosaic.version = 11 : i64} {
  func.func @_ffn_kernel(%arg0: i32, %arg1: memref<8x10xf32, #tpu.memory_space<vmem>>, %arg2: memref<10x128xf32, #tpu.memory_space<vmem>>, %arg3: memref<1x128xf32, #tpu.memory_space<vmem>>, %arg4: memref<128x128xf32, #tpu.memory_space<vmem>>, %arg5: memref<1x128xf32, #tpu.memory_space<vmem>>, %arg6: memref<1x128xf32, #tpu.memory_space<vmem>>, %arg7: memref<1x1xf32, #tpu.memory_space<vmem>>, %arg8: memref<8x1xf32, #tpu.memory_space<vmem>>) attributes {dimension_semantics = [#tpu.dimension_semantics<parallel>], iteration_bounds = array<i64: 2>, scalar_prefetch = 0 : i64, scratch_operands = 0 : i64, tpu.core_type = #tpu.core_type<tc>, window_params = [{transform_indices = @transform_0, window_bounds = array<i64: 8, 10>}, {pipeline_mode = #tpu.pipeline_mode<synchronous>, transform_indices = @transform_1, window_bounds = array<i64: 10, 128>}, {pipeline_mode = #tpu.pipeline_mode<synchronous>, transform_indices = @transform_2, window_bounds = array<i64: 1, 128>}, {pipeline_mode = #tpu.pipeline_mode<synchronous>, transform_indices = @transform_3, window_bounds = array<i64: 128, 128>}, {pipeline_mode = #tpu.pipeline_mode<synchronous>, transform_indices = @transform_4, window_bounds = array<i64: 1, 128>}, {pipeline_mode = #tpu.pipeline_mode<synchronous>, transform_indices = @transform_5, window_bounds = array<i64: 1, 128>}, {pipeline_mode = #tpu.pipeline_mode<synchronous>, transform_indices = @transform_6, window_bounds = array<i64: 1, 1>}, {transform_indices = @transform_7, window_bounds = array<i64: 8, 1>}]} {
    %c0 = arith.constant 0 : index
    %c0_0 = arith.constant 0 : index
    %0 = vector.load %arg1[%c0, %c0_0] : memref<8x10xf32, #tpu.memory_space<vmem>>, vector<8x10xf32>
    %c0_1 = arith.constant 0 : index
    %c0_2 = arith.constant 0 : index
    %1 = vector.load %arg2[%c0_1, %c0_2] : memref<10x128xf32, #tpu.memory_space<vmem>>, vector<10x128xf32>
    %cst = arith.constant dense<0.000000e+00> : vector<8x128xf32>
    %2 = tpu.matmul %0, %1, %cst {dimension_numbers = #tpu.dot_dimension_numbers<[1], [0], [0], [1], [0, 0, 1, 1], [], []>} : vector<8x10xf32>, vector<10x128xf32>, vector<8x128xf32> -> vector<8x128xf32>
    %c0_3 = arith.constant 0 : index
    %c0_4 = arith.constant 0 : index
    %3 = vector.load %arg3[%c0_3, %c0_4] : memref<1x128xf32, #tpu.memory_space<vmem>>, vector<1x128xf32>
    %4 = vector.broadcast %3 : vector<1x128xf32> to vector<8x128xf32>
    %5 = arith.addf %2, %4 : vector<8x128xf32>
    %cst_5 = arith.constant 0.000000e+00 : f32
    %6 = vector.broadcast %cst_5 : f32 to vector<8x128xf32>
    %7 = arith.maximumf %5, %6 : vector<8x128xf32>
    %c0_6 = arith.constant 0 : index
    %c0_7 = arith.constant 0 : index
    %8 = vector.load %arg4[%c0_6, %c0_7] : memref<128x128xf32, #tpu.memory_space<vmem>>, vector<128x128xf32>
    %cst_8 = arith.constant dense<0.000000e+00> : vector<8x128xf32>
    %9 = tpu.matmul %7, %8, %cst_8 {dimension_numbers = #tpu.dot_dimension_numbers<[1], [0], [0], [1], [0, 0, 1, 1], [], []>} : vector<8x128xf32>, vector<128x128xf32>, vector<8x128xf32> -> vector<8x128xf32>
    %c0_9 = arith.constant 0 : index
    %c0_10 = arith.constant 0 : index
    %10 = vector.load %arg5[%c0_9, %c0_10] : memref<1x128xf32, #tpu.memory_space<vmem>>, vector<1x128xf32>
    %11 = vector.broadcast %10 : vector<1x128xf32> to vector<8x128xf32>
    %12 = arith.addf %9, %11 : vector<8x128xf32>
    %cst_11 = arith.constant 0.000000e+00 : f32
    %13 = vector.broadcast %cst_11 : f32 to vector<8x128xf32>
    %14 = arith.maximumf %12, %13 : vector<8x128xf32>
    %c0_12 = arith.constant 0 : index
    %c0_13 = arith.constant 0 : index
    %15 = vector.load %arg6[%c0_12, %c0_13] : memref<1x128xf32, #tpu.memory_space<vmem>>, vector<1x128xf32>
    %16 = vector.broadcast %15 : vector<1x128xf32> to vector<8x128xf32>
    %17 = arith.mulf %14, %16 : vector<8x128xf32>
    %cst_14 = arith.constant dense<0.000000e+00> : vector<8xf32>
    %18 = vector.multi_reduction <add>, %17, %cst_14 [1] : vector<8x128xf32> to vector<8xf32>
    %19 = vector.shape_cast %18 : vector<8xf32> to vector<8x1xf32>
    %c0_15 = arith.constant 0 : index
    %c0_16 = arith.constant 0 : index
    %20 = vector.load %arg7[%c0_15, %c0_16] : memref<1x1xf32, #tpu.memory_space<vmem>>, vector<1x1xf32>
    %21 = vector.broadcast %20 : vector<1x1xf32> to vector<8x1xf32>
    %22 = arith.addf %19, %21 : vector<8x1xf32>
    %c0_17 = arith.constant 0 : index
    %c0_18 = arith.constant 0 : index
    %23 = vector.load %arg8[%c0_17, %c0_18] : memref<8x1xf32, #tpu.memory_space<vmem>>, vector<8x1xf32>
    tpu.vector_store %arg8[%c0_17, %c0_18], %22 {strides = array<i32>} : memref<8x1xf32, #tpu.memory_space<vmem>>, vector<8x1xf32>,
    return
  }
  func.func @transform_0(%arg0: i32) -> (i32, i32) {
    %c0_i32 = arith.constant 0 : i32
    %c0_i32_0 = arith.constant 0 : i32
    return %arg0, %c0_i32 : i32, i32
  }
  func.func @transform_1(%arg0: i32) -> (i32, i32) {
    %c0_i32 = arith.constant 0 : i32
    %c0_i32_0 = arith.constant 0 : i32
    %c0_i32_1 = arith.constant 0 : i32
    return %c0_i32, %c0_i32_0 : i32, i32
  }
  func.func @transform_2(%arg0: i32) -> (i32, i32) {
    %c0_i32 = arith.constant 0 : i32
    %c0_i32_0 = arith.constant 0 : i32
    %c0_i32_1 = arith.constant 0 : i32
    return %c0_i32, %c0_i32_0 : i32, i32
  }
  func.func @transform_3(%arg0: i32) -> (i32, i32) {
    %c0_i32 = arith.constant 0 : i32
    %c0_i32_0 = arith.constant 0 : i32
    %c0_i32_1 = arith.constant 0 : i32
    return %c0_i32, %c0_i32_0 : i32, i32
  }
  func.func @transform_4(%arg0: i32) -> (i32, i32) {
    %c0_i32 = arith.constant 0 : i32
    %c0_i32_0 = arith.constant 0 : i32
    %c0_i32_1 = arith.constant 0 : i32
    return %c0_i32, %c0_i32_0 : i32, i32
  }
  func.func @transform_5(%arg0: i32) -> (i32, i32) {
    %c0_i32 = arith.constant 0 : i32
    %c0_i32_0 = arith.constant 0 : i32
    %c0_i32_1 = arith.constant 0 : i32
    return %c0_i32, %c0_i32_0 : i32, i32
  }
  func.func @transform_6(%arg0: i32) -> (i32, i32) {
    %c0_i32 = arith.constant 0 : i32
    %c0_i32_0 = arith.constant 0 : i32
    %c0_i32_1 = arith.constant 0 : i32
    return %c0_i32, %c0_i32_0 : i32, i32
  }
  func.func @transform_7(%arg0: i32) -> (i32, i32) {
    %c0_i32 = arith.constant 0 : i32
    %c0_i32_0 = arith.constant 0 : i32
    return %arg0, %c0_i32 : i32, i32
  }
}

</mosaic_0001>

<bundles_post_ra>
// kernel: feedforward.1
= control target key start
LH: loop header
LB: loop body
LE: loop exit
PB: predicated region body
PF: predicated region fallthrough
CT: control target
= control target key end

     0   :  { %s672_s26 = smov 0   ;;  %s761_s0 = inlined_call_operand.vmem [shape: f32[16,10], index: 0, kind: input, shape index: {}]   ;;  %s762_s1 = inlined_call_operand.vmem [shape: f32[10,128], index: 1, kind: input, shape index: {}]   ;;  %s763_s2 = inlined_call_operand.vmem [shape: f32[1,128], index: 2, kind: input, shape index: {}]   ;;  %s764_s3 = inlined_call_operand.vmem [shape: f32[128,128], index: 3, kind: input, shape index: {}]   ;;  %s765_s4 = inlined_call_operand.vmem [shape: f32[1,128], index: 4, kind: input, shape index: {}]   ;;  %s766_s5 = inlined_call_operand.vmem [shape: f32[1,128], index: 5, kind: input, shape index: {}]   ;;  %s767_s6 = inlined_call_operand.<no memory space> [shape: f32[1,1], index: 6, kind: input, shape index: {}]   ;;  %s768_s7 = inlined_call_operand.vmem [shape: f32[16,1], index: 7, kind: output, shape index: {}]  }
   0x1   :  { %v12_v0 = vstv %s767_s6 }
   0x2   :  { %13 = vst [vmem:[#allocation2] sm:$0x1] %v12_v0 }
   0x3 LB: > { %s532_s27 = sadd.s32 4294967295, %s625_s26   ;;  %p536_p0 = scmp.ge.s32.totalorder %s625_s26, 1  ;;  %s625_s26 = sphi %s672_s26, %s19_s26  }
   0x4   : > { %p238_p1 = scmp.lt.s32.totalorder %s625_s26, 3 }
   0x6   : > { %p239_p2 = pnand %p536_p0, %p238_p1 }
   0x7   : > { %p268_p3 = scmp.lt.s32.totalorder (!%p239_p2), %s532_s27, 1 }
   0x8   : > { %242 = sbr.rel (%p239_p2) target bundleno = 556 (0x22c), region = 48 }
   0xd   : > { %v278_v1 = vld [vmem:[%s762_s1 + $0x8] sm:$0x3]  ;;  %vm290_vm0 = vcmask 1041408   ;;  %v627_v2 = vmov 0.0   ;;  %v277_v3 = vld [vmem:[%s762_s1] sm:$0xff]  ;;  %vm628_vm1 = vmmov 0  }
   0xe   : > { %567 = vmatprep.subr.mxu0 %v627_v2  ;;  %571 = vmatprep.mubr.msk.f32.mxu0 %vm628_vm1, %v627_v2  ;;  %v380_v4 = vld [vmem:[%s764_s3 + $0x78] sm:$0xff]  ;;  %v379_v5 = vld [vmem:[%s764_s3 + $0x70] sm:$0xff]  ;;  %s770_s27 = smov (!%p268_p3, %s532_s27), 1  ;;  %v378_v6 = vld [vmem:[%s764_s3 + $0x68] sm:$0xff]  ;;  %vm286_vm2 = vcmask 80896   ;;  %vm477_vm3 = vcmask 7168  }
   0xf   : > { %568 = vmatpush3.msk.msra.mxu0 %vm290_vm0, %v278_v1  ;;  %574 = vmatprep.subr.mxu1 %v627_v2  ;;  %s537_s14 = sshll.u32 %s770_s27, 3  ;;  %v377_v7 = vld [vmem:[%s764_s3 + $0x60] sm:$0xff]  ;;  %v376_v9 = vld [vmem:[%s764_s3 + $0x58] sm:$0xff]  ;;  %v375_v10 = vld [vmem:[%s764_s3 + $0x50] sm:$0xff] }
  0x10   : > { %569 = vmatprep.subr.mxu0 %v627_v2  ;;  %575 = vmatpush3.msra.mxu1 %v380_v4  ;;  %s271_s17 = scalar_lea.vmem %s761_s0, %s537_s14  ;;  %v374_v11 = vld [vmem:[%s764_s3 + $0x48] sm:$0xff]  ;;  %v373_v12 = vld [vmem:[%s764_s3 + $0x40] sm:$0xff]  ;;  %v372_v13 = vld [vmem:[%s764_s3 + $0x38] sm:$0xff]  ;;  %s275_s9 = scalar_lea.vmem %s768_s7, %s537_s14 }
  0x11   : > { %570 = vmatpush3.msra.mxu0 %v277_v3  ;;  %576 = vmatprep.subr.mxu1 %v627_v2  ;;  %v276_v8 = vld [vmem:[%s271_s17] sm:$0xff]  ;;  %v371_v14 = vld [vmem:[%s764_s3 + $0x30] sm:$0xff]  ;;  %v370_v15 = vld [vmem:[%s764_s3 + $0x28] sm:$0xff] }
  0x12   : > { %577 = vmatpush3.msra.mxu1 %v379_v5  ;;  %606 = vmatprep.mubr.msk.f32.mxu1 %vm628_vm1, %v627_v2  ;;  %v369_v16 = vld [vmem:[%s764_s3 + $0x20] sm:$0xff]  ;;  %v368_v17 = vld [vmem:[%s764_s3 + $0x18] sm:$0xff]  ;;  %v367_v18 = vld [vmem:[%s764_s3 + $0x10] sm:$0xff] }
  0x13   : > { %578 = vmatprep.subr.mxu1 %v627_v2  ;;  %572 = vmatmul.mubr.msk.f32.vlgmr.msra.gmra.mxu0 %vm286_vm2, %v276_v8  ;;  %v366_v19 = vld [vmem:[%s764_s3 + $0x8] sm:$0xff]  ;;  %v365_v20 = vld [vmem:[%s764_s3] sm:$0xff] }
  0x14   : > { %579 = vmatpush3.msra.mxu1 %v378_v6  ;;  %v539_v21 = vld [vmem:[%s763_s2] ss:$0 sm:$0xff] }
  0x15   : > { %580 = vmatprep.subr.mxu1 %v627_v2  ;;  %v542_v26 = vld [vmem:[%s765_s4] ss:$0 sm:$0xff] }
  0x16   : > { %581 = vmatpush3.msra.mxu1 %v377_v7  ;;  %v543_v30 = vld [vmem:[%s766_s5] ss:$0 sm:$0xff] }
  0x17   : > { %582 = vmatprep.subr.mxu1 %v627_v2  ;;  %v544_v33 = vld [vmem:[#allocation2] ss:$0 sm:$0xff] }
  0x18   : > { %583 = vmatpush3.msra.mxu1 %v376_v9 }
  0x19   : > { %584 = vmatprep.subr.mxu1 %v627_v2 }
  0x1a   : > { %585 = vmatpush3.msra.mxu1 %v375_v10 }
  0x1b   : > { %586 = vmatprep.subr.mxu1 %v627_v2 }
  0x1c   : > { %587 = vmatpush3.msra.mxu1 %v374_v11 }
  0x1d   : > { %588 = vmatprep.subr.mxu1 %v627_v2 }
  0x1e   : > { %589 = vmatpush3.msra.mxu1 %v373_v12 }
  0x1f   : > { %590 = vmatprep.subr.mxu1 %v627_v2 }
  0x20   : > { %591 = vmatpush3.msra.mxu1 %v372_v13 }
  0x21   : > { %592 = vmatprep.subr.mxu1 %v627_v2 }
  0x22   : > { %593 = vmatpush3.msra.mxu1 %v371_v14 }
  0x23   : > { %594 = vmatprep.subr.mxu1 %v627_v2 }
  0x24   : > { %595 = vmatpush3.msra.mxu1 %v370_v15 }
  0x25   : > { %596 = vmatprep.subr.mxu1 %v627_v2 }
  0x26   : > { %597 = vmatpush3.msra.mxu1 %v369_v16 }
  0x27   : > { %598 = vmatprep.subr.mxu1 %v627_v2 }
  0x28   : > { %599 = vmatpush3.msra.mxu1 %v368_v17 }
  0x29   : > { %600 = vmatprep.subr.mxu1 %v627_v2 }
  0x2a   : > { %601 = vmatpush3.msra.mxu1 %v367_v18 }
  0x2b   : > { %602 = vmatprep.subr.mxu1 %v627_v2 }
  0x2c   : > { %603 = vmatpush3.msra.mxu1 %v366_v19 }
  0x2d   : > { %604 = vmatprep.subr.mxu1 %v627_v2 }
  0x2e   : > { %605 = vmatpush3.msra.mxu1 %v365_v20 }
  0xd3   : > { %v360_v22 = vpop.f32.mrf.mxu0 }
  0xd4   : > { %v361_v23 = vadd.f32 %v539_v21, %v360_v22 }
  0xd5   : > { %v573_v24 = vpop.f32.mrf.mxu0 }
  0xd6   : > { %v364_v25 = vmax.f32 %v361_v23, 0.0 }
  0xd8   : > { %607 = vmatmul.mubr.f32.vlgmr.msra.gmra.mxu1 %v364_v25 }
 0x198   : > { %v454_v27 = vpop.f32.mrf.mxu1 }
 0x199   : > { %v455_v28 = vadd.f32 %v542_v26, %v454_v27 }
 0x19a   : > { %v608_v29 = vpop.f32.mrf.mxu1 }
 0x19b   : > { %v458_v31 = vmax.f32 %v455_v28, 0.0 }
 0x19d   : > { %v466_v32 = vmul.f32 %v543_v30, %v458_v31 }
 0x19f   : > { %467 = vadd.xlane.f32.xlu0 %v466_v32 }
 0x228   : > { %v468_v34 = vpop.xlane.xlu0 %467 }
 0x229   : > { %v476_v35 = vadd.f32 %v544_v33, %v468_v34 }
 0x22b   : > { %478 = vst.msk [vmem:[%s275_s9] sm:$0xff] %vm477_vm3, %v476_v35 }
 0x22c PF: > { %s19_s26 = sadd.s32 1, %s625_s26  }
 0x22d   : > { %p16_p4 = scmp.ge.s32.totalorder %s19_s26, 4  }
 0x22f   :  { %18 = sbr.rel (!%p16_p4) target bundleno = 3 (0x3), region = 78 }

</bundles_post_ra>
